<compile_context>
chip_gen: v6e
topology: v6e:2x2x1
jax: 0.10.0
libtpu: 0.0.40
codegen_flags: <defaults>
</compile_context>

<pallas_src>
import functools

import jax
import jax.numpy as jnp
from jax import lax
from jax.experimental import pallas as pl
from jax.experimental.pallas import tpu as pltpu


def _mean_pool_kernel(dec_ref, out_ref, acc_ref, *, t_total, inv_t, mask_needed):
    """Accumulate the time-sum of one (tile_b, tile_t, C_lane) chunk."""
    t_idx = pl.program_id(1)

    @pl.when(t_idx == 0)
    def _init():
        acc_ref[...] = jnp.zeros_like(acc_ref)

    # Per-chunk cast + accumulate (never a full-tensor f32 copy).
    x = dec_ref[...].astype(jnp.float32)
    if mask_needed:
        tile_t = dec_ref.shape[1]
        row = lax.broadcasted_iota(jnp.int32, dec_ref.shape, 1) + t_idx * tile_t
        x = jnp.where(row < t_total, x, 0.0)
    acc_ref[...] += jnp.sum(x, axis=1)

    @pl.when(t_idx == pl.num_programs(1) - 1)
    def _finalize():
        # Scale by 1 / (full time length of the kernel view), not the tile size.
        out_ref[...] = (acc_ref[...] * inv_t).astype(out_ref.dtype)


def mean_pool(logits, decision, pooldim=1, *, target_tile_bytes=2 * 1024 * 1024):
    """Pallas implementation of MeanPool.forward(logits, decision)."""
    del logits  # unused by the reference module
    if pooldim != 1 or decision.ndim != 3:
        # TODO(synk): general pooldim / rank handled outside this kernel.
        return jnp.mean(decision, axis=pooldim)

    B, T, C = decision.shape
    dtype = decision.dtype
    itemsize = dtype.itemsize

    # ---- lane-dense folding for small C ------------------------------------
    fold_k = 1
    if C < 128 and 128 % C == 0:
        k = 128 // C
        if T % k == 0 and T // k > 0:
            fold_k = k
    T_kern = T // fold_k
    C_lane = C * fold_k
    dec = decision.reshape(B, T_kern, C_lane) if fold_k > 1 else decision

    # ---- tile sizes ---------------------------------------------------------
    # Batch tiling: only split B if it stays a multiple of 8 (sublane rule on
    # the (B, C) output block); otherwise keep the full batch per block.
    tile_b = 8 if (B > 8 and B % 8 == 0) else B

    # Time tiling: ~target_tile_bytes per input buffer, rounded to the sublane
    # packing of the input dtype, so double-buffering fits default scoped VMEM
    # on every generation (v5e 16 MiB, v6e 32 MiB, v7x 32 MiB).
    sublane = max(8, 32 // itemsize)
    row_bytes = max(1, tile_b * C_lane * itemsize)
    tile_t = max(1, target_tile_bytes // row_bytes)
    tile_t = min(tile_t, T_kern)
    if tile_t < T_kern:
        tile_t = max(sublane, (tile_t // sublane) * sublane)
        tile_t = min(tile_t, T_kern)

    grid = (pl.cdiv(B, tile_b), pl.cdiv(T_kern, tile_t))
    mask_needed = (T_kern % tile_t) != 0

    kernel = functools.partial(
        _mean_pool_kernel,
        t_total=T_kern,
        inv_t=1.0 / T_kern,
        mask_needed=mask_needed,
    )

    out = pl.pallas_call(
        kernel,
        out_shape=jax.ShapeDtypeStruct((B, C_lane), dtype),
        grid_spec=pltpu.PrefetchScalarGridSpec(
            num_scalar_prefetch=0,
            grid=grid,
            in_specs=[
                pl.BlockSpec((tile_b, tile_t, C_lane), lambda b, t: (b, t, 0)),
            ],
            out_specs=pl.BlockSpec((tile_b, C_lane), lambda b, t: (b, 0)),
            scratch_shapes=[pltpu.VMEM((tile_b, C_lane), jnp.float32)],
        ),
        compiler_params=pltpu.CompilerParams(
            dimension_semantics=("parallel", "arbitrary"),
        ),
        cost_estimate=pl.CostEstimate(
            flops=B * T * C,
            transcendentals=0,
            bytes_accessed=B * T * C * itemsize + B * C * itemsize,
        ),
    )(dec)

    if fold_k > 1:
        # Finish the k-way fold: (B, k*C) -> (B, k, C) -> mean over k.
        out = (
            out.reshape(B, fold_k, C)
            .astype(jnp.float32)
            .mean(axis=1)
            .astype(dtype)
        )
    return out


if __name__ == "__main__":
    key = jax.random.PRNGKey(0)
    k_logits, k_decision, k_d2, k_d3 = jax.random.split(key, 4)

    # Primary check: matches the module's usual (batch, time, classes) layout.
    B, T, C = 2, 8, 32
    logits = jax.random.normal(k_logits, (B, T, C), dtype=jnp.float32)
    decision = jax.random.uniform(k_decision, (B, T, C), dtype=jnp.float32)

    out = mean_pool(logits, decision, pooldim=1)
    out = jax.block_until_ready(out)
    ref = jnp.mean(decision, axis=1)
    assert out.shape == (B, C), out.shape
    assert jnp.allclose(out, ref, atol=1e-5, rtol=1e-5), "mismatch vs jnp.mean"

    # Exercise the gridded/masked accumulation path (tiny tiles force a grid
    # over T with a partial last tile).
    d2 = jax.random.uniform(k_d2, (2, 40, 32), dtype=jnp.float32)
    o2 = jax.block_until_ready(mean_pool(None, d2, pooldim=1, target_tile_bytes=1024))
    assert jnp.allclose(o2, jnp.mean(d2, axis=1), atol=1e-5, rtol=1e-5)

    # Exercise the non-folded path (C not a divisor of 128).
    d3 = jax.random.uniform(k_d3, (2, 24, 100), dtype=jnp.float32)
    o3 = jax.block_until_ready(mean_pool(None, d3, pooldim=1, target_tile_bytes=1024))
    assert jnp.allclose(o3, jnp.mean(d3, axis=1), atol=1e-5, rtol=1e-5)

    print("KERNEL_OK")
</pallas_src>

<mosaic_0001>
module attributes {stable_mosaic.version = 11 : i64} {
  func.func @_mean_pool_kernel(%arg0: i32, %arg1: i32, %arg2: memref<2x2x128xf32, #tpu.memory_space<vmem>>, %arg3: memref<2x128xf32, #tpu.memory_space<vmem>>, %arg4: memref<2x128xf32, #tpu.memory_space<vmem>>) attributes {dimension_semantics = [#tpu.dimension_semantics<parallel>, #tpu.dimension_semantics<arbitrary>], iteration_bounds = array<i64: 1, 1>, scalar_prefetch = 0 : i64, scratch_operands = 1 : i64, tpu.core_type = #tpu.core_type<tc>, window_params = [{transform_indices = @transform_0, window_bounds = array<i64: 2, 2, 128>}, {transform_indices = @transform_1, window_bounds = array<i64: 2, 128>}]} {
    %c0_i32 = arith.constant 0 : i32
    %0 = arith.cmpi eq, %arg1, %c0_i32 : i32
    %1 = arith.extui %0 : i1 to i32
    %c0_i32_0 = arith.constant 0 : i32
    %2 = arith.cmpi ne, %1, %c0_i32_0 : i32
    scf.if %2 {
      %cst_9 = arith.constant 0.000000e+00 : f32
      %11 = vector.broadcast %cst_9 : f32 to vector<2x128xf32>
      %c0_10 = arith.constant 0 : index
      %c0_11 = arith.constant 0 : index
      %12 = vector.load %arg4[%c0_10, %c0_11] : memref<2x128xf32, #tpu.memory_space<vmem>>, vector<2x128xf32>
      tpu.vector_store %arg4[%c0_10, %c0_11], %11 {strides = array<i32>} : memref<2x128xf32, #tpu.memory_space<vmem>>, vector<2x128xf32>,
    } else {
    }
    %c0 = arith.constant 0 : index
    %c0_1 = arith.constant 0 : index
    %c0_2 = arith.constant 0 : index
    %3 = vector.load %arg2[%c0, %c0_1, %c0_2] : memref<2x2x128xf32, #tpu.memory_space<vmem>>, vector<2x2x128xf32>
    %c0_3 = arith.constant 0 : index
    %c0_4 = arith.constant 0 : index
    %4 = vector.load %arg4[%c0_3, %c0_4] : memref<2x128xf32, #tpu.memory_space<vmem>>, vector<2x128xf32>
    %cst = arith.constant dense<0.000000e+00> : vector<2x128xf32>
    %5 = vector.multi_reduction <add>, %3, %cst [1] : vector<2x2x128xf32> to vector<2x128xf32>
    %6 = arith.addf %4, %5 : vector<2x128xf32>
    %c0_5 = arith.constant 0 : index
    %c0_6 = arith.constant 0 : index
    %7 = vector.load %arg4[%c0_5, %c0_6] : memref<2x128xf32, #tpu.memory_space<vmem>>, vector<2x128xf32>
    tpu.vector_store %arg4[%c0_5, %c0_6], %6 {strides = array<i32>} : memref<2x128xf32, #tpu.memory_space<vmem>>, vector<2x128xf32>,
    %c0_i32_7 = arith.constant 0 : i32
    %8 = arith.cmpi eq, %arg1, %c0_i32_7 : i32
    %9 = arith.extui %8 : i1 to i32
    %c0_i32_8 = arith.constant 0 : i32
    %10 = arith.cmpi ne, %9, %c0_i32_8 : i32
    scf.if %10 {
      %c0_9 = arith.constant 0 : index
      %c0_10 = arith.constant 0 : index
      %11 = vector.load %arg4[%c0_9, %c0_10] : memref<2x128xf32, #tpu.memory_space<vmem>>, vector<2x128xf32>
      %cst_11 = arith.constant 5.000000e-01 : f32
      %12 = vector.broadcast %cst_11 : f32 to vector<2x128xf32>
      %13 = arith.mulf %11, %12 : vector<2x128xf32>
      %c0_12 = arith.constant 0 : index
      %c0_13 = arith.constant 0 : index
      %14 = vector.load %arg3[%c0_12, %c0_13] : memref<2x128xf32, #tpu.memory_space<vmem>>, vector<2x128xf32>
      tpu.vector_store %arg3[%c0_12, %c0_13], %13 {strides = array<i32>} : memref<2x128xf32, #tpu.memory_space<vmem>>, vector<2x128xf32>,
    } else {
    }
    return
  }
  func.func @transform_0(%arg0: i32, %arg1: i32) -> (i32, i32, i32) {
    %c0_i32 = arith.constant 0 : i32
    %c0_i32_0 = arith.constant 0 : i32
    return %arg0, %arg1, %c0_i32 : i32, i32, i32
  }
  func.func @transform_1(%arg0: i32, %arg1: i32) -> (i32, i32) {
    %c0_i32 = arith.constant 0 : i32
    %c0_i32_0 = arith.constant 0 : i32
    return %arg0, %c0_i32 : i32, i32
  }
}

</mosaic_0001>

<bundles_post_ra>
// kernel: tpu_custom_call.1
= control target key start
LH: loop header
LB: loop body
LE: loop exit
PB: predicated region body
PF: predicated region fallthrough
CT: control target
= control target key end

     0   :  { %6 = vsyncpa [#allocation4], 0  ;;  %s144_s0 = inlined_call_operand.hbm [shape: f32[2,2,128], index: 0, kind: input, shape index: {}]   ;;  %s145_s1 = inlined_call_operand.hbm [shape: f32[2,128], index: 1, kind: output, shape index: {}]  }
   0x1   :  { %7 = vsyncpa [#allocation5], 0  ;;  %s123_s6 = smov [#allocation3]  }
   0x2   :  { %s13_s7 = sshll.u32 %s123_s6, 4  ;;  %s14_s7 = int_to_ptr.vmem [resolvable:$true] %s13_s7 }
   0x3   :  { %s87_s8 = scalar_lea.vmem %s14_s7, 64  ;;  %p92_p1 = scmp.lt.s32.totalorder %s14_s7, %s14_s7 }
   0x4   :  { %p88_p0 = scmp.ne.s32.totalorder %s14_s7, %s87_s8  ;;  %p93_p2 = scmp.lt.s32.totalorder %s87_s8, %s87_s8 }
   0x6   :  { %p94_p3 = por %p93_p2, %p92_p1 }
   0x8   :  { %p95_p4 = pnand %p94_p3, %p88_p0 }
   0xa   :  { %98 = shalt.err (!%p95_p4)
}
   0xb   :  { %s124_s9 = smov 32   ;;  %s125_s10 = smov 2  }
   0xc   :  { %19 = dma.hbm_to_vmem [thread:$0]  %s144_s0, 64, %s14_s7, [#allocation4], %s124_s9, %s124_s9, %s125_s10  }
   0xd   :  { %119 = dma.done.wait [#allocation4], 64  }
   0xe   :  { %120 = vsyncadd [#allocation4], 4294967232  ;;  %v126_v0 = vmov 0.0   ;;  %vm31_vm0 = vcmask 1041408   ;;  %v28_v1 = vld [vmem:[#allocation3] sm:$0x3] }
   0xf   :  { %27 = vst [vmem:[#allocation2] sm:$0x3] %v126_v0  ;;  %v29_v2 = vld [vmem:[#allocation3 + $0x2] sm:$0x3]  ;;  %v32_v3 = vsel %vm31_vm0, %v28_v1, 0.0  ;;  %vm48_vm1 = vcmask 1041409  }
  0x10   :  { %v39_v4 = vsel %vm31_vm0, %v29_v2, 0.0  ;;  %v33_v5 = vrot.slane %v32_v3, 4  ;;  %s127_s0 = smov [#allocation6]  }
  0x11   :  { %v40_v6 = vrot.slane %v39_v4, 4  ;;  %s65_s13 = sshll.u32 %s127_s0, 4  ;;  %s66_s13 = int_to_ptr.vmem [resolvable:$true] %s65_s13 }
  0x12   :  { %v34_v7 = vadd.f32 %v33_v5, %v32_v3  ;;  %s99_s14 = scalar_lea.vmem %s66_s13, 32  ;;  %p104_p6 = scmp.lt.s32.totalorder %s66_s13, %s66_s13 }
  0x13   :  { %v41_v8 = vadd.f32 %v40_v6, %v39_v4  ;;  %p100_p5 = scmp.ne.s32.totalorder %s66_s13, %s99_s14  ;;  %p105_p7 = scmp.lt.s32.totalorder %s99_s14, %s99_s14 }
  0x14   :  { %v35_v9 = vrot.slane %v34_v7, 2 }
  0x15   :  { %v42_v10 = vrot.slane %v41_v8, 2  ;;  %p106_p8 = por %p105_p7, %p104_p6 }
  0x16   :  { %v36_v11 = vadd.f32 %v35_v9, %v34_v7  ;;  %v30_v15 = vld [vmem:[#allocation2] sm:$0x3] }
  0x17   :  { %v43_v12 = vadd.f32 %v42_v10, %v41_v8  ;;  %p107_p9 = pnand %p106_p8, %p100_p5 }
  0x18   :  { %v37_v13 = vrot.slane %v36_v11, 1 }
  0x19   :  { %v44_v14 = vrot.slane %v43_v12, 1 }
  0x1a   :  { %v38_v16 = vadd.f32 %v37_v13, %v36_v11 }
  0x1b   :  { %v45_v17 = vadd.f32 %v44_v14, %v43_v12 }
  0x1d   :  { %v49_v18 = vsel %vm48_vm1, %v45_v17, %v38_v16 }
  0x1e   :  { %v51_v19 = vadd.f32 %v49_v18, %v30_v15 }
  0x20   :  { %52 = vst [vmem:[#allocation2] sm:$0x3] %v51_v19 }
  0x27   :  { %v56_v20 = vld [vmem:[#allocation2] sm:$0x3] }
  0x28   :  { %v57_v21 = vmul.f32 0.5, %v56_v20 }
  0x2a   :  { %58 = vst [vmem:[#allocation6] sm:$0x3] %v57_v21 }
  0x2b   :  { %110 = shalt.err (!%p107_p9)
}
  0x2c   :  { %68 = dma.vmem_to_hbm [thread:$0]  %s66_s13, 32, %s145_s1, [#allocation5]  }
  0x2d   :  { %121 = dma.done.wait [#allocation5], 32  }
  0x2e   :  { %122 = vsyncadd [#allocation5], 4294967264 }
  0x2f   :  { %72 = vsyncpa [#allocation4], 1 }
  0x30   :  { %73 = vsyncpa [#allocation5], 1 }

</bundles_post_ra>
